<compile_context>
chip_gen: v6e
topology: v6e:2x2x1
jax: 0.10.0
libtpu: 0.0.40
codegen_flags: <defaults>
</compile_context>

<pallas_src>
import jax
import jax.numpy as jnp
from jax.experimental import pallas as pl
from jax.experimental.pallas import tpu as pltpu


LANES = 128
SUBLANES = 8


def _prox_kernel(sigma_ref, xk_ref, f_ref, out_ref):
    # sigma_ref: (1,) scalar in SMEM; xk_ref/f_ref/out_ref: (tile_rows, 128) VMEM tiles.
    sigma = sigma_ref[0]
    out_ref[...] = (xk_ref[...] - sigma * f_ref[...]) / (1.0 + sigma)


def _pick_tile_rows(rows, max_tile_rows):
    """Choose a tile height (multiple of 8) that (a) caps VMEM use and
    (b) gives a >= 2 step grid whenever rows allows it (v7x megacore)."""
    max_tile_rows = max(SUBLANES, (max_tile_rows // SUBLANES) * SUBLANES)
    half = -(-rows // 2)                       # cdiv(rows, 2)
    half_rounded = -(-half // SUBLANES) * SUBLANES
    return max(SUBLANES, min(max_tile_rows, half_rounded))


def prox_l2T_learnable(xk, f, sigma, *, max_tile_rows=2048):
    """Elementwise proximal operator. xk, f: same shape, float32. sigma: scalar float32."""
    assert xk.shape == f.shape
    orig_shape = xk.shape
    n_elem = xk.size

    xk = xk.astype(jnp.float32)
    f = f.astype(jnp.float32)

    rows = -(-n_elem // LANES)                 # cdiv(n_elem, LANES)
    padded_elems = rows * LANES
    needs_pad = padded_elems != n_elem         # static Python-level decision

    xk_flat = xk.reshape(-1)
    f_flat = f.reshape(-1)
    if needs_pad:
        # Pad only to the next multiple of 128 (<= 127 elems), not to a tile multiple.
        xk_flat = jnp.pad(xk_flat, (0, padded_elems - n_elem))
        f_flat = jnp.pad(f_flat, (0, padded_elems - n_elem))
    xk_2d = xk_flat.reshape(rows, LANES)
    f_2d = f_flat.reshape(rows, LANES)

    sigma_arr = jnp.asarray(sigma, dtype=jnp.float32).reshape((1,))

    tile_rows = _pick_tile_rows(rows, max_tile_rows)
    grid = (pl.cdiv(rows, tile_rows),)         # ragged last block handled by Pallas

    out_2d = pl.pallas_call(
        _prox_kernel,
        out_shape=jax.ShapeDtypeStruct((rows, LANES), jnp.float32),
        grid=grid,
        in_specs=[
            pl.BlockSpec(memory_space=pltpu.SMEM),                 # sigma scalar, untiled
            pl.BlockSpec((tile_rows, LANES), lambda i: (i, 0)),
            pl.BlockSpec((tile_rows, LANES), lambda i: (i, 0)),
        ],
        out_specs=pl.BlockSpec((tile_rows, LANES), lambda i: (i, 0)),
        compiler_params=pltpu.CompilerParams(
            dimension_semantics=("parallel",),
            vmem_limit_bytes=32 * 1024 * 1024,
        ),
    )(sigma_arr, xk_2d, f_2d)

    if needs_pad:
        return out_2d.reshape(-1)[:n_elem].reshape(orig_shape)
    return out_2d.reshape(orig_shape)          # free bitcast (contiguous, no padding)


if __name__ == "__main__":
    key = jax.random.PRNGKey(0)
    k1, k2, k3, k4 = jax.random.split(key, 4)

    # Small NCHW shapes consistent with an image-restoration module.
    B, C, H, W = 2, 4, 16, 16
    xk = jax.random.normal(k1, (B, C, H, W), dtype=jnp.float32)
    f = jax.random.normal(k2, (B, C, H, W), dtype=jnp.float32)

    # Deterministic parameter init (the module takes `sigma` at construction).
    sigma = jnp.float32(0.5)

    out = prox_l2T_learnable(xk, f, sigma)
    out = jax.block_until_ready(out)

    ref = (xk - sigma * f) / (1.0 + sigma)
    assert out.shape == xk.shape and out.dtype == jnp.float32
    assert jnp.allclose(out, ref, atol=1e-6, rtol=1e-6)

    # Quick check of the ragged (non-multiple-of-128) path.
    xk2 = jax.random.normal(k3, (1, 3, 7, 5), dtype=jnp.float32)
    f2 = jax.random.normal(k4, (1, 3, 7, 5), dtype=jnp.float32)
    out2 = jax.block_until_ready(prox_l2T_learnable(xk2, f2, sigma))
    ref2 = (xk2 - sigma * f2) / (1.0 + sigma)
    assert out2.shape == xk2.shape
    assert jnp.allclose(out2, ref2, atol=1e-6, rtol=1e-6)

    print("KERNEL_OK")
</pallas_src>

<mosaic_0001>
module attributes {stable_mosaic.version = 11 : i64} {
  func.func @_prox_kernel(%arg0: i32, %arg1: memref<1xf32, #tpu.memory_space<smem>>, %arg2: memref<8x128xf32, #tpu.memory_space<vmem>>, %arg3: memref<8x128xf32, #tpu.memory_space<vmem>>, %arg4: memref<8x128xf32, #tpu.memory_space<vmem>>) attributes {dimension_semantics = [#tpu.dimension_semantics<parallel>], iteration_bounds = array<i64: 2>, scalar_prefetch = 0 : i64, scratch_operands = 0 : i64, tpu.core_type = #tpu.core_type<tc>, window_params = [{transform_indices = @transform_0, window_bounds = array<i64: 1>}, {transform_indices = @transform_1, window_bounds = array<i64: 8, 128>}, {transform_indices = @transform_2, window_bounds = array<i64: 8, 128>}, {transform_indices = @transform_3, window_bounds = array<i64: 8, 128>}]} {
    %c0 = arith.constant 0 : index
    %0 = memref.load %arg1[%c0] : memref<1xf32, #tpu.memory_space<smem>>
    %c0_0 = arith.constant 0 : index
    %c0_1 = arith.constant 0 : index
    %1 = vector.load %arg2[%c0_0, %c0_1] : memref<8x128xf32, #tpu.memory_space<vmem>>, vector<8x128xf32>
    %c0_2 = arith.constant 0 : index
    %c0_3 = arith.constant 0 : index
    %2 = vector.load %arg3[%c0_2, %c0_3] : memref<8x128xf32, #tpu.memory_space<vmem>>, vector<8x128xf32>
    %3 = vector.broadcast %0 : f32 to vector<8x128xf32>
    %4 = arith.mulf %3, %2 : vector<8x128xf32>
    %5 = arith.subf %1, %4 : vector<8x128xf32>
    %cst = arith.constant 1.000000e+00 : f32
    %6 = arith.addf %cst, %0 : f32
    %7 = vector.broadcast %6 : f32 to vector<8x128xf32>
    %8 = arith.divf %5, %7 : vector<8x128xf32>
    %c0_4 = arith.constant 0 : index
    %c0_5 = arith.constant 0 : index
    %9 = vector.load %arg4[%c0_4, %c0_5] : memref<8x128xf32, #tpu.memory_space<vmem>>, vector<8x128xf32>
    tpu.vector_store %arg4[%c0_4, %c0_5], %8 {strides = array<i32>} : memref<8x128xf32, #tpu.memory_space<vmem>>, vector<8x128xf32>,
    return
  }
  func.func @transform_0(%arg0: i32) -> i32 {
    %c0_i32 = arith.constant 0 : i32
    %c0_i32_0 = arith.constant 0 : i32
    return %c0_i32 : i32
  }
  func.func @transform_1(%arg0: i32) -> (i32, i32) {
    %c0_i32 = arith.constant 0 : i32
    %c0_i32_0 = arith.constant 0 : i32
    return %arg0, %c0_i32 : i32, i32
  }
  func.func @transform_2(%arg0: i32) -> (i32, i32) {
    %c0_i32 = arith.constant 0 : i32
    %c0_i32_0 = arith.constant 0 : i32
    return %arg0, %c0_i32 : i32, i32
  }
  func.func @transform_3(%arg0: i32) -> (i32, i32) {
    %c0_i32 = arith.constant 0 : i32
    %c0_i32_0 = arith.constant 0 : i32
    return %arg0, %c0_i32 : i32, i32
  }
}

</mosaic_0001>

<bundles_post_ra>
// kernel: tpu_custom_call.1
= control target key start
LH: loop header
LB: loop body
LE: loop exit
PB: predicated region body
PF: predicated region fallthrough
CT: control target
= control target key end

     0   :  { %s756_s0 = inlined_call_operand.<no memory space> [shape: f32[1], index: 0, kind: input, shape index: {}]   ;;  %s757_s1 = inlined_call_operand.hbm [shape: f32[16,128], index: 1, kind: input, shape index: {}]   ;;  %s758_s2 = inlined_call_operand.hbm [shape: f32[16,128], index: 2, kind: input, shape index: {}]   ;;  %s759_s3 = inlined_call_operand.hbm [shape: f32[16,128], index: 3, kind: output, shape index: {}]  }
   0x1   :  { %8 = sst [smem:[#allocation2]] %s756_s0 }
   0x2   :  { %9 = vsyncpa [#allocation4], 0 }
   0x3   :  { %11 = vsyncpa [#allocation4 + $0x1], 0 }
   0x4   :  { %12 = vsyncpa [#allocation7], 0 }
   0x5   :  { %14 = vsyncpa [#allocation7 + $0x1], 0 }
   0x6   :  { %15 = vsyncpa [#allocation5], 0 }
   0x7   :  { %17 = vsyncpa [#allocation5 + $0x1], 0  ;;  %s562_s14 = smov 0   ;;  %s564_s15 = smov 0  }
   0x8   :  { %s566_s16 = smov 0   ;;  %s568_s17 = smov 0  }
   0x9 LB: > { %s583_s0 = sadd.s32 4294967295, %s534_s17   ;;  %s342_s18 = sadd.s32 4294967294, %s534_s17   ;;  %s534_s17 = sphi %s568_s17, %s778_s17   ;;  %s530_s16 = sphi %s566_s16, %s777_s16   ;;  %s526_s15 = sphi %s564_s15, %s776_s15   ;;  %s522_s14 = sphi %s562_s14, %s775_s14  }
   0xa   : > { %s587_s19 = sadd.s32 1, %s534_s17   ;;  %s51_s20 = sadd.s32 1, %s530_s16 }
   0xb   : > { %s48_s21 = ssub.s32 %s534_s17, %s587_s19  ;;  %p58_p0 = scmp.ne.s32.totalorder %s530_s16, %s526_s15 }
   0xc   : > { %p49_p1 = scmp.eq.s32.totalorder %s48_s21, 0  ;;  %p59_p2 = scmp.eq.s32.totalorder %s534_s17, 0 }
   0xd   : > { %p64_p3 = scmp.ne.s32.totalorder %s526_s15, %s522_s14  ;;  %p65_p4 = scmp.eq.s32.totalorder %s583_s0, 0 }
   0xe   : > { %s599_s22 = scalar_select %p49_p1, %s530_s16, %s51_s20  }
   0xf   : > { %p601_p5 = por %p59_p2, %p58_p0  ;;  %p605_p6 = por %p65_p4, %p64_p3 }
  0x10   : > { %p114_p7 = scmp.eq.s32.totalorder %s583_s0, 1  ;;  %p120_p8 = scmp.eq.s32.totalorder %s342_s18, 1 }
  0x11   : > { %s763_s24 = scalar_select %p605_p6, 1, 0 }
  0x12   : > { %p374_p10 = scmp.lt.s32.totalorder %s534_s17, 2  ;;  %p612_p11 = por %p114_p7, %p58_p0 }
  0x13   : > { %p616_p12 = por %p120_p8, %p64_p3  ;;  %s621_s27 = sand.u32 1, %s530_s16  }
  0x14   : > { %s764_s25 = scalar_select %p612_p11, 1, 0 }
  0x15   : > { %s765_s26 = scalar_select %p616_p12, 1, 0 }
  0x16   : > { %s346_s28 = sshll.u32 %s534_s17, 7  ;;  %s345_s29 = sshll.u32 %s621_s27, 3 }
  0x17   : > { %s630_s5 = scalar_lea.hbm %s757_s1, %s346_s28  ;;  %s147_s6 = scalar_lea.vmem [#allocation3], %s345_s29 }
  0x18   : > { %s154_s7 = sshll.u32 %s147_s6, 4  ;;  %p636_p13 = pnand %p374_p10, %p601_p5  ;;  %s640_s7 = int_to_ptr.vmem [resolvable:$true] %s154_s7 }
  0x19   : > { %s144_s9 = scalar_lea.sflag [#allocation4], %s621_s27  ;;  %s410_s10 = scalar_lea.hbm %s630_s5, 128 }
  0x1a   : > { %p411_p2 = scmp.ne.s32.totalorder %s630_s5, %s410_s10  ;;  %p412_p3 = pneg %p636_p13 }
  0x1b   : > { %s415_s13 = scalar_lea.hbm %s757_s1, 256  ;;  %p416_p5 = scmp.lt.s32.totalorder %s630_s5, %s757_s1 }
  0x1c   : > { %p413_p4 = pnand %p412_p3, %p411_p2  ;;  %p417_p8 = scmp.lt.s32.totalorder %s415_s13, %s410_s10 }
  0x1e   : > { %p414_p7 = pneg %p413_p4  ;;  %p418_p10 = por %p417_p8, %p416_p5 }
  0x20   : > { %p419_p9 = pnand %p418_p10, %p414_p7 }
  0x22   : > { %422 = shalt.err (!%p419_p9)
}
  0x23   : > { %s423_s21 = scalar_lea.vmem %s640_s7, 128  ;;  %s536_s23 = smov [#allocation3]  }
  0x24   : > { %p424_p0 = scmp.ne.s32.totalorder %s640_s7, %s423_s21  ;;  %s428_s30 = sshll.u32 %s536_s23, 4  ;;  %s429_s30 = int_to_ptr.vmem [resolvable:$false] %s428_s30 }
  0x25   : > { %s430_s4 = scalar_lea.vmem %s429_s30, 256  ;;  %p431_p1 = scmp.lt.s32.totalorder %s640_s7, %s429_s30 }
  0x26   : > { %p426_p2 = pnand %p424_p0, %p412_p3  ;;  %p432_p12 = scmp.lt.s32.totalorder %s430_s4, %s423_s21 }
  0x28   : > { %p427_p4 = pneg %p426_p2  ;;  %p433_p11 = por %p432_p12, %p431_p1 }
  0x2a   : > { %p434_p5 = pnand %p433_p11, %p427_p4 }
  0x2c   : > { %437 = shalt.err (!%p434_p5)
}
  0x2d   : > { %366 = dma.hbm_to_vmem [thread:$0]  (!%p636_p13), %s630_s5, 128, %s640_s7, %s144_s9  }
  0x2e   : > { %p767_p9 = scmp.lt.s32.totalorder %s534_s17, 3  ;;  %p768_p0 = scmp.ge.s32.totalorder %s534_s17, 1 }
  0x2f   : > { %s682_s12 = scalar_lea.hbm %s758_s2, %s346_s28  ;;  %s165_s13 = scalar_lea.vmem [#allocation6], %s345_s29 }
  0x30   : > { %p673_p7 = pnand %p768_p0, %p767_p9  ;;  %s172_s18 = sshll.u32 %s165_s13, 4  ;;  %s173_s18 = int_to_ptr.vmem [resolvable:$true] %s172_s18 }
  0x31   : > { %s162_s5 = scalar_lea.sflag [#allocation7], %s621_s27  ;;  %s438_s7 = scalar_lea.hbm %s682_s12, 128 }
  0x32   : > { %s769_s6 = scalar_select %p673_p7, 1, 0 }
  0x33   : > { %p439_p11 = scmp.ne.s32.totalorder %s682_s12, %s438_s7  ;;  %s443_s21 = scalar_lea.hbm %s758_s2, 256 }
  0x34   : > { %p444_p8 = scmp.lt.s32.totalorder %s682_s12, %s758_s2  ;;  %p445_p10 = scmp.lt.s32.totalorder %s443_s21, %s438_s7 }
  0x35   : > { %p441_p12 = pnand %p439_p11, %p412_p3 }
  0x36   : > { %p446_p2 = por %p445_p10, %p444_p8 }
  0x37   : > { %p442_p1 = pneg %p441_p12 }
  0x39   : > { %p447_p4 = pnand %p446_p2, %p442_p1 }
  0x3b   : > { %450 = shalt.err (!%p447_p4)
}
  0x3c   : > { %s451_s29 = scalar_lea.vmem %s173_s18, 128  ;;  %s537_s27 = smov [#allocation6]  }
  0x3d   : > { %p452_p5 = scmp.ne.s32.totalorder %s173_s18, %s451_s29  ;;  %s456_s30 = sshll.u32 %s537_s27, 4  ;;  %s457_s30 = int_to_ptr.vmem [resolvable:$false] %s456_s30 }
  0x3e   : > { %s458_s4 = scalar_lea.vmem %s457_s30, 256  ;;  %p459_p11 = scmp.lt.s32.totalorder %s173_s18, %s457_s30 }
  0x3f   : > { %p454_p9 = pnand %p452_p5, %p412_p3  ;;  %p460_p12 = scmp.lt.s32.totalorder %s458_s4, %s451_s29 }
  0x41   : > { %p455_p0 = pneg %p454_p9  ;;  %p461_p6 = por %p460_p12, %p459_p11 }
  0x43   : > { %p462_p7 = pnand %p461_p6, %p455_p0 }
  0x45   : > { %465 = shalt.err (!%p462_p7)
}
  0x46   : > { %369 = dma.hbm_to_vmem [thread:$0]  (!%p636_p13), %s682_s12, 128, %s173_s18, %s162_s5  }
  0x47   : > { %p770_p1 = scmp.ne.s32.totalorder %s769_s6, 0 }
  0x48   : > { %s708_s10 = sand.u32 (!%p770_p1), 1, %s526_s15   ;;  %p771_p3 = scmp.ne.s32.totalorder (!%p770_p1), %s763_s24, 0 }
  0x49   : > { %181 = sbr.rel (%p770_p1) target bundleno = 119 (0x77), region = 32  ;;  %s350_s11 = sshll.u32 (!%p770_p1), %s708_s10, 3 }
  0x4a   : > { %s184_s13 = scalar_lea.sflag (!%p770_p1), [#allocation4], %s708_s10  ;;  %s187_s7 = scalar_lea.vmem (!%p770_p1), [#allocation3], %s350_s11 }
  0x4e   : > { %509 = dma.done.wait (%p771_p3), %s184_s13, 128  }
  0x4f   : > { %511 = vsyncadd (%p771_p3), %s184_s13, 4294967168  ;;  %s193_s8 = scalar_lea.sflag [#allocation7], %s708_s10  ;;  %s196_s12 = scalar_lea.vmem [#allocation6], %s350_s11 }
  0x50   : > { %513 = dma.done.wait (%p771_p3), %s193_s8, 128  }
  0x51   : > { %515 = vsyncadd (%p771_p3), %s193_s8, 4294967168  ;;  %s224_s6 = sld [smem:[#allocation2]]  ;;  %v226_v1 = vld [vmem:[%s196_s12] sm:$0xff]  ;;  %v225_v4 = vld [vmem:[%s187_s7] sm:$0xff]  ;;  %s223_s5 = scalar_lea.vmem [#allocation8], %s350_s11 }
  0x52   : > { %s249_s9 = sshll.u32 %s223_s5, 4  ;;  %s354_s20 = sshll.u32 %s583_s0, 7  ;;  %s250_s9 = int_to_ptr.vmem [resolvable:$true] %s249_s9 }
  0x53   : > { %s247_s28 = scalar_lea.hbm %s759_s3, %s354_s20  ;;  %s236_s23 = scalar_lea.sflag [#allocation5], %s708_s10 }
  0x54   : > { %s466_s29 = scalar_lea.vmem %s250_s9, 128  ;;  %p772_p13 = scmp.ne.s32.totalorder %s764_s25, 0 }
  0x55   : > { %p467_p6 = scmp.ne.s32.totalorder %s250_s9, %s466_s29  ;;  %s538_s27 = smov [#allocation8]  }
  0x56   : > { %s470_s30 = sshll.u32 %s538_s27, 4  ;;  %s471_s30 = int_to_ptr.vmem [resolvable:$false] %s470_s30 }
  0x57   : > { %s230_s18 = sadd.f32 1.0, %s224_s6  ;;  %v227_v2 = vstv %s224_s6  ;;  %p468_p7 = pnand %p467_p6, %p772_p13 }
  0x58   : > { %v228_v3 = vmul.f32 %v227_v2, %v226_v1  ;;  %s472_s4 = scalar_lea.vmem %s471_s30, 256  ;;  %p473_p10 = scmp.lt.s32.totalorder %s250_s9, %s471_s30 }
  0x59   : > { %v231_v0 = vstv %s230_s18  ;;  %p469_p8 = pneg %p468_p7  ;;  %p474_p2 = scmp.lt.s32.totalorder %s472_s4, %s466_s29 }
  0x5a   : > { %408 = vrcp.f32 %v231_v0  ;;  %v229_v5 = vsub.f32 %v225_v4, %v228_v3 }
  0x5b   : > { %p475_p4 = por %p474_p2, %p473_p10 }
  0x5d   : > { %p476_p5 = pnand %p475_p4, %p469_p8 }
  0x67   : > { %v409_v6 = vpop.eup %408 }
  0x68   : > { %v233_v7 = vmul.f32 %v409_v6, %v229_v5 }
  0x6a   : > { %234 = vst [vmem:[%s223_s5] sm:$0xff] %v233_v7 }
  0x6b   : > { %479 = shalt.err (!%p476_p5)
}
  0x6c   : > { %s480_s0 = scalar_lea.hbm %s247_s28, 128  ;;  %s484_s13 = scalar_lea.hbm %s759_s3, 256 }
  0x6d   : > { %p481_p9 = scmp.ne.s32.totalorder %s247_s28, %s480_s0  ;;  %p485_p12 = scmp.lt.s32.totalorder %s247_s28, %s759_s3 }
  0x6e   : > { %p486_p1 = scmp.lt.s32.totalorder %s484_s13, %s480_s0 }
  0x6f   : > { %p482_p0 = pnand %p481_p9, %p772_p13 }
  0x70   : > { %p487_p3 = por %p486_p1, %p485_p12 }
  0x71   : > { %p483_p11 = pneg %p482_p0 }
  0x73   : > { %p488_p6 = pnand %p487_p3, %p483_p11 }
  0x75   : > { %491 = shalt.err (!%p488_p6)
}
  0x76   : > { %361 = dma.vmem_to_hbm [thread:$0]  (%p772_p13), %s250_s9, 128, %s247_s28, %s236_s23  }
  0x77 PF: > { %s261_s12 = sand.u32 1, %s522_s14   ;;  %p773_p7 = scmp.ne.s32.totalorder %s765_s26, 0 }
  0x78   : > { %p774_p8 = scmp.ge.s32.totalorder %s534_s17, 2  ;;  %s262_s6 = scalar_lea.sflag [#allocation5], %s261_s12 }
  0x7a   : > { %p371_p10 = pnand %p774_p8, %p773_p7 }
  0x7c   : > { %p372_p2 = pneg %p371_p10 }
  0x7e   : > { %517 = dma.done.wait (%p372_p2), %s262_s6, 128  }
  0x7f   : > { %519 = vsyncadd (%p372_p2), %s262_s6, 4294967168  ;;  %p20_p4 = scmp.ge.s32.totalorder %s587_s19, 4   ;;  %s775_s14 = smov %s526_s15 }
  0x80   : > { %s776_s15 = smov %s530_s16  ;;  %s777_s16 = smov %s599_s22 }
  0x81   : > { %s778_s17 = smov %s587_s19  ;;  %22 = sbr.rel (!%p20_p4) target bundleno = 9 (0x9), region = 90 }
  0x86   :  { %267 = vsyncpa [#allocation4], 1 }
  0x87   :  { %269 = vsyncpa [#allocation4 + $0x1], 1 }
  0x88   :  { %270 = vsyncpa [#allocation7], 1 }
  0x89   :  { %272 = vsyncpa [#allocation7 + $0x1], 1 }
  0x8a   :  { %273 = vsyncpa [#allocation5], 1 }
  0x8b   :  { %275 = vsyncpa [#allocation5 + $0x1], 1 }

</bundles_post_ra>
